<compile_context>
chip_gen: v6e
topology: v6e:2x2x1
jax: 0.10.0
libtpu: 0.0.40
codegen_flags: <defaults>
</compile_context>

<pallas_src>
import numpy as np
import jax
import jax.numpy as jnp
from jax.experimental import pallas as pl
from jax.experimental.pallas import tpu as pltpu


def _round_up(x: int, m: int) -> int:
    return ((x + m - 1) // m) * m


_SUBLANE = {4: 8, 2: 16, 1: 32}   # sublane multiple by itemsize


def _device_budgets():
    """Return (per-copy input-tile byte budget, vmem_limit_bytes)."""
    kind = ""
    try:
        kind = jax.devices()[0].device_kind.lower()
    except Exception:
        pass
    if any(t in kind for t in ("v3", "v4", "v5", "v6")):
        # 128 MiB physical VMEM: big double-buffered tiles, raised scoped limit.
        return 24 * 1024 * 1024, 64 << 20
    # Conservative default (covers v7x's 64 MiB/TC and unknown chips).
    return 12 * 1024 * 1024, 40 << 20


# ----------------------------------------------------------------------------
# Packed kernel: C <= 64, r = 128 // C original rows per packed row.
#   logits_ref : (tile, w=r*C) native dtype   (lane-dense)
#   targets_ref: (tile, r)     int32          (padded rows carry -1)
#   within_ref : (1, w)  f32   class index within each C-wide lane group
#   e_ref      : (r, w)  f32   E[g, j] = 1 if j belongs to group g (broadcast)
#   p_ref      : (w, r)  f32   E^T                              (group reduce)
#   out_ref    : (8, 128) f32  per-core block (count broadcast into it)
#   acc_ref    : (1, r)  f32   per-core per-lane partial counts
# ----------------------------------------------------------------------------
def _packed_kernel(logits_ref, targets_ref, within_ref, e_ref, p_ref,
                   out_ref, acc_ref):
    step = pl.program_id(1)

    @pl.when(step == 0)
    def _():
        acc_ref[...] = jnp.zeros_like(acc_ref)

    lf = logits_ref[...].astype(jnp.float32)           # (tile, w)
    tgf = targets_ref[...].astype(jnp.float32)         # (tile, r)
    within = within_ref[...]                           # (1, w)
    e_mat = e_ref[...]                                  # (r, w)
    p_mat = p_ref[...]                                  # (w, r)
    n_classes = lf.shape[1] // tgf.shape[1]

    # Target class index broadcast to every lane of its group (exact: ints <= 63).
    t_exp = jnp.dot(tgf, e_mat, preferred_element_type=jnp.float32)       # (tile, w)
    sel = within == t_exp                               # one-hot of target in its group

    # Target logit per group, broadcast back to the group (exact selection-sum).
    tl_grp = jnp.dot(jnp.where(sel, lf, 0.0), p_mat,
                     preferred_element_type=jnp.float32)                  # (tile, r)
    tl_exp = jnp.dot(tl_grp, e_mat, preferred_element_type=jnp.float32)   # (tile, w)

    # Position j "beats" the target (prevents first-occurrence argmax == target):
    #   j <  t : logits[j] >= logits[t]
    #   j >= t : logits[j] >  logits[t]   (j == t is trivially False)
    beats = jnp.where(within < t_exp,
                      (lf >= tl_exp).astype(jnp.float32),
                      (lf > tl_exp).astype(jnp.float32))                  # (tile, w)
    viol = jnp.dot(beats, p_mat, preferred_element_type=jnp.float32)      # (tile, r)

    valid = (tgf >= 0.0) & (tgf < float(n_classes))     # padded rows carry -1
    correct = (valid & (viol == 0.0)).astype(jnp.float32)                 # (tile, r)
    acc_ref[...] += jnp.sum(correct, axis=0, keepdims=True)               # (1, r)

    @pl.when(step == pl.num_programs(1) - 1)
    def _():
        total = jnp.sum(acc_ref[...], axis=-1, keepdims=True)             # (1, 1)
        # Lane-dense, unmasked store of the per-core partial count.
        out_ref[...] = jnp.broadcast_to(total, out_ref.shape)


# ----------------------------------------------------------------------------
# Unpacked kernel: C > 64 (class dim already reasonably lane-dense).
# ----------------------------------------------------------------------------
def _unpacked_kernel(logits_ref, targets_ref, out_ref, acc_ref):
    step = pl.program_id(1)

    @pl.when(step == 0)
    def _():
        acc_ref[...] = jnp.zeros_like(acc_ref)

    logits = logits_ref[...]
    targets = targets_ref[...]
    tn, c = logits.shape

    # argmax along the class (lane) axis, first-occurrence tie-break.
    col_ids = jax.lax.broadcasted_iota(jnp.int32, (tn, c), 1)
    max_val = jnp.max(logits, axis=-1, keepdims=True)
    is_max = logits == max_val
    pred = jnp.min(jnp.where(is_max, col_ids, c), axis=-1, keepdims=True)  # (tn, 1)

    correct = (pred == targets).astype(jnp.float32)                        # (tn, 1)
    acc_ref[...] += jnp.sum(correct, axis=0, keepdims=True)                # (1, 1)

    @pl.when(step == pl.num_programs(1) - 1)
    def _():
        out_ref[...] = jnp.broadcast_to(acc_ref[...], out_ref.shape)


# ----------------------------------------------------------------------------
# Wrappers
# ----------------------------------------------------------------------------
def _count_correct_packed(logits, targets):
    n, c = logits.shape
    itemsize = jnp.dtype(logits.dtype).itemsize
    sub = _SUBLANE.get(itemsize, 8)
    n_cores = 2                                    # 2 TCs on v7x, harmless loop elsewhere
    budget, vmem_limit = _device_budgets()

    r = 128 // c                                   # original rows per packed row (>= 2)
    w = r * c                                      # packed lane width (<= 128)

    packed_rows_raw = -(-n // r)
    rows_per_core_raw = -(-packed_rows_raw // n_cores)

    # Physical bytes per packed row: lane-padded logits + lane-padded int32 targets.
    bytes_per_row = _round_up(w, 128) * itemsize + _round_up(r, 128) * 4
    tile_budget = max(sub, (budget // bytes_per_row) // sub * sub)
    tile = max(sub, min(tile_budget, _round_up(rows_per_core_raw, sub)))

    tiles_per_core = -(-rows_per_core_raw // tile)
    packed_rows = tiles_per_core * tile * n_cores
    n_padded = packed_rows * r

    if n_padded != n:
        logits = jnp.pad(logits, ((0, n_padded - n), (0, 0)))
        targets = jnp.pad(targets, (0, n_padded - n), constant_values=-1)
    logits_p = logits.reshape(packed_rows, w)       # lane-dense packed layout
    targets_p = targets.reshape(packed_rows, r)

    # Small constant matrices for group broadcast / group reduce (MXU).
    group = np.repeat(np.arange(r, dtype=np.int32), c)                       # (w,)
    within = np.tile(np.arange(c, dtype=np.float32), r).reshape(1, w)
    e_mat = (group[None, :] == np.arange(r, dtype=np.int32)[:, None])
    e_mat = e_mat.astype(np.float32)                                         # (r, w)
    p_mat = np.ascontiguousarray(e_mat.T)                                    # (w, r)

    def row_map(j, i):
        return (j * tiles_per_core + i, 0)

    const_map = lambda j, i: (0, 0)

    partial = pl.pallas_call(
        _packed_kernel,
        out_shape=jax.ShapeDtypeStruct((n_cores * 8, 128), jnp.float32),
        grid_spec=pltpu.PrefetchScalarGridSpec(
            num_scalar_prefetch=0,
            grid=(n_cores, tiles_per_core),
            in_specs=[
                pl.BlockSpec((tile, w), row_map),
                pl.BlockSpec((tile, r), row_map),
                pl.BlockSpec((1, w), const_map),
                pl.BlockSpec((r, w), const_map),
                pl.BlockSpec((w, r), const_map),
            ],
            out_specs=pl.BlockSpec((8, 128), lambda j, i: (j, 0)),
            scratch_shapes=[pltpu.VMEM((1, r), jnp.float32)],
        ),
        compiler_params=pltpu.CompilerParams(
            dimension_semantics=("parallel", "arbitrary"),
            vmem_limit_bytes=vmem_limit,
        ),
        cost_estimate=pl.CostEstimate(
            flops=8 * packed_rows * w * r,
            transcendentals=0,
            bytes_accessed=packed_rows * (w * itemsize + r * 4)
            + n_cores * 8 * 128 * 4,
        ),
    )(logits_p, targets_p, jnp.asarray(within), jnp.asarray(e_mat),
      jnp.asarray(p_mat))

    return jnp.sum(partial[::8, 0])


def _count_correct_unpacked(logits, targets):
    n, c = logits.shape
    itemsize = jnp.dtype(logits.dtype).itemsize
    sub = _SUBLANE.get(itemsize, 8)
    n_cores = 2
    budget, vmem_limit = _device_budgets()

    rows_per_core_raw = -(-n // n_cores)
    # Physical bytes per row: lane-padded logits + lane-padded (row, 1) int32 target.
    bytes_per_row = _round_up(c, 128) * itemsize + 128 * 4
    tile_budget = (budget // bytes_per_row) // sub * sub
    if tile_budget < sub:
        # TODO(synk): class-chunked two-pass argmax for extremely large n_classes.
        raise ValueError(f"n_classes={c} too large for a single-tile VMEM budget")
    tile = max(sub, min(tile_budget, _round_up(rows_per_core_raw, sub)))

    tiles_per_core = -(-rows_per_core_raw // tile)
    padded_n = tiles_per_core * tile * n_cores

    targets2 = targets.reshape(-1, 1)
    if padded_n != n:
        logits = jnp.pad(logits, ((0, padded_n - n), (0, 0)))
        targets2 = jnp.pad(targets2, ((0, padded_n - n), (0, 0)), constant_values=-1)

    def row_map(j, i):
        return (j * tiles_per_core + i, 0)

    partial = pl.pallas_call(
        _unpacked_kernel,
        out_shape=jax.ShapeDtypeStruct((n_cores * 8, 128), jnp.float32),
        grid_spec=pltpu.PrefetchScalarGridSpec(
            num_scalar_prefetch=0,
            grid=(n_cores, tiles_per_core),
            in_specs=[
                pl.BlockSpec((tile, c), row_map),
                pl.BlockSpec((tile, 1), row_map),
            ],
            out_specs=pl.BlockSpec((8, 128), lambda j, i: (j, 0)),
            scratch_shapes=[pltpu.VMEM((1, 1), jnp.float32)],
        ),
        compiler_params=pltpu.CompilerParams(
            dimension_semantics=("parallel", "arbitrary"),
            vmem_limit_bytes=vmem_limit,
        ),
        cost_estimate=pl.CostEstimate(
            flops=2 * padded_n * c,
            transcendentals=0,
            bytes_accessed=padded_n * c * itemsize + padded_n * 4
            + n_cores * 8 * 128 * 4,
        ),
    )(logits, targets2)

    return jnp.sum(partial[::8, 0])


def accuracy_metric(predicted_logits: jax.Array,
                    true_targets: jax.Array,
                    reduction: str = "mean") -> jax.Array:
    """predicted_logits: (..., C) float; true_targets: (...) int. Scalar f32."""
    if reduction not in ("mean", "sum"):
        # TODO(synk): reduction='none' (per-element output) not implemented in-kernel.
        raise ValueError(f"Unsupported reduction '{reduction}'")

    n_classes = predicted_logits.shape[-1]
    logits = predicted_logits.reshape(-1, n_classes)        # native dtype, free reshape
    targets = true_targets.reshape(-1).astype(jnp.int32)
    n = logits.shape[0]

    if n_classes <= 64:
        total_correct = _count_correct_packed(logits, targets)
    else:
        total_correct = _count_correct_unpacked(logits, targets)

    # Note: f32 count is exact up to ~2^24 correct samples per lane per core.
    if reduction == "mean":
        return total_correct / jnp.float32(n)
    return total_correct


def _reference(predicted_logits, true_targets):
    pred = jnp.argmax(predicted_logits, axis=-1).reshape(-1)
    true = true_targets.reshape(-1)
    return jnp.mean((pred == true).astype(jnp.float32))


if __name__ == "__main__":
    key = jax.random.PRNGKey(0)
    k1, k2, k3, k4, k5, k6 = jax.random.split(key, 6)

    # Test 1: (batch, seq, n_classes) logits, (batch, seq) targets -> packed path.
    batch, seq, n_classes = 2, 8, 4
    logits = jax.random.normal(k1, (batch, seq, n_classes), dtype=jnp.float32)
    targets = jax.random.randint(k2, (batch, seq), 0, n_classes, dtype=jnp.int32)
    result = accuracy_metric(logits, targets)
    jax.block_until_ready(result)
    ref = _reference(logits, targets)
    assert jnp.allclose(result, ref, atol=1e-6), (result, ref)

    # Test 2: ragged sizes, non-power-of-two C, bf16 logits (packed path + padding).
    logits2 = jax.random.normal(k3, (3, 37, 5), dtype=jnp.bfloat16)
    targets2 = jax.random.randint(k4, (3, 37), 0, 5, dtype=jnp.int32)
    result2 = accuracy_metric(logits2, targets2)
    jax.block_until_ready(result2)
    ref2 = _reference(logits2, targets2)
    assert jnp.allclose(result2, ref2, atol=1e-6), (result2, ref2)

    # Test 3: large class count -> lane-axis argmax fallback, 'sum' reduction.
    logits3 = jax.random.normal(k5, (2, 6, 130), dtype=jnp.float32)
    targets3 = jax.random.randint(k6, (2, 6), 0, 130, dtype=jnp.int32)
    result3 = accuracy_metric(logits3, targets3, reduction="sum")
    jax.block_until_ready(result3)
    ref3 = jnp.sum((jnp.argmax(logits3, axis=-1).reshape(-1)
                    == targets3.reshape(-1)).astype(jnp.float32))
    assert jnp.allclose(result3, ref3, atol=1e-6), (result3, ref3)

    print("KERNEL_OK")
</pallas_src>

<mosaic_0001>
module attributes {stable_mosaic.version = 11 : i64} {
  func.func @_packed_kernel(%arg0: i32, %arg1: i32, %arg2: memref<8x128xf32, #tpu.memory_space<vmem>>, %arg3: memref<8x32xi32, #tpu.memory_space<vmem>>, %arg4: memref<1x128xf32, #tpu.memory_space<vmem>>, %arg5: memref<32x128xf32, #tpu.memory_space<vmem>>, %arg6: memref<128x32xf32, #tpu.memory_space<vmem>>, %arg7: memref<8x128xf32, #tpu.memory_space<vmem>>, %arg8: memref<1x32xf32, #tpu.memory_space<vmem>>) attributes {dimension_semantics = [#tpu.dimension_semantics<parallel>, #tpu.dimension_semantics<arbitrary>], iteration_bounds = array<i64: 2, 1>, scalar_prefetch = 0 : i64, scratch_operands = 1 : i64, tpu.core_type = #tpu.core_type<tc>, window_params = [{transform_indices = @transform_0, window_bounds = array<i64: 8, 128>}, {transform_indices = @transform_1, window_bounds = array<i64: 8, 32>}, {pipeline_mode = #tpu.pipeline_mode<synchronous>, transform_indices = @transform_2, window_bounds = array<i64: 1, 128>}, {pipeline_mode = #tpu.pipeline_mode<synchronous>, transform_indices = @transform_3, window_bounds = array<i64: 32, 128>}, {pipeline_mode = #tpu.pipeline_mode<synchronous>, transform_indices = @transform_4, window_bounds = array<i64: 128, 32>}, {transform_indices = @transform_5, window_bounds = array<i64: 8, 128>}]} {
    %c0_i32 = arith.constant 0 : i32
    %0 = arith.cmpi eq, %arg1, %c0_i32 : i32
    %1 = arith.extui %0 : i1 to i32
    %c0_i32_0 = arith.constant 0 : i32
    %2 = arith.cmpi ne, %1, %c0_i32_0 : i32
    scf.if %2 {
      %cst_24 = arith.constant 0.000000e+00 : f32
      %44 = vector.broadcast %cst_24 : f32 to vector<1x32xf32>
      %c0_25 = arith.constant 0 : index
      %c0_26 = arith.constant 0 : index
      %45 = vector.load %arg8[%c0_25, %c0_26] : memref<1x32xf32, #tpu.memory_space<vmem>>, vector<1x32xf32>
      tpu.vector_store %arg8[%c0_25, %c0_26], %44 {strides = array<i32>} : memref<1x32xf32, #tpu.memory_space<vmem>>, vector<1x32xf32>,
    } else {
    }
    %c0 = arith.constant 0 : index
    %c0_1 = arith.constant 0 : index
    %3 = vector.load %arg2[%c0, %c0_1] : memref<8x128xf32, #tpu.memory_space<vmem>>, vector<8x128xf32>
    %c0_2 = arith.constant 0 : index
    %c0_3 = arith.constant 0 : index
    %4 = vector.load %arg3[%c0_2, %c0_3] : memref<8x32xi32, #tpu.memory_space<vmem>>, vector<8x32xi32>
    %5 = arith.sitofp %4 : vector<8x32xi32> to vector<8x32xf32>
    %c0_4 = arith.constant 0 : index
    %c0_5 = arith.constant 0 : index
    %6 = vector.load %arg4[%c0_4, %c0_5] : memref<1x128xf32, #tpu.memory_space<vmem>>, vector<1x128xf32>
    %c0_6 = arith.constant 0 : index
    %c0_7 = arith.constant 0 : index
    %7 = vector.load %arg5[%c0_6, %c0_7] : memref<32x128xf32, #tpu.memory_space<vmem>>, vector<32x128xf32>
    %c0_8 = arith.constant 0 : index
    %c0_9 = arith.constant 0 : index
    %8 = vector.load %arg6[%c0_8, %c0_9] : memref<128x32xf32, #tpu.memory_space<vmem>>, vector<128x32xf32>
    %cst = arith.constant dense<0.000000e+00> : vector<8x128xf32>
    %9 = tpu.matmul %5, %7, %cst {dimension_numbers = #tpu.dot_dimension_numbers<[1], [0], [0], [1], [0, 0, 1, 1], [], []>} : vector<8x32xf32>, vector<32x128xf32>, vector<8x128xf32> -> vector<8x128xf32>
    %10 = vector.broadcast %6 : vector<1x128xf32> to vector<8x128xf32>
    %11 = arith.cmpf oeq, %10, %9 : vector<8x128xf32>
    %cst_10 = arith.constant 0.000000e+00 : f32
    %12 = vector.broadcast %cst_10 : f32 to vector<8x128xf32>
    %13 = arith.select %11, %3, %12 : vector<8x128xi1>, vector<8x128xf32>
    %cst_11 = arith.constant dense<0.000000e+00> : vector<8x32xf32>
    %14 = tpu.matmul %13, %8, %cst_11 {dimension_numbers = #tpu.dot_dimension_numbers<[1], [0], [0], [1], [0, 0, 1, 1], [], []>} : vector<8x128xf32>, vector<128x32xf32>, vector<8x32xf32> -> vector<8x32xf32>
    %cst_12 = arith.constant dense<0.000000e+00> : vector<8x128xf32>
    %15 = tpu.matmul %14, %7, %cst_12 {dimension_numbers = #tpu.dot_dimension_numbers<[1], [0], [0], [1], [0, 0, 1, 1], [], []>} : vector<8x32xf32>, vector<32x128xf32>, vector<8x128xf32> -> vector<8x128xf32>
    %16 = vector.broadcast %6 : vector<1x128xf32> to vector<8x128xf32>
    %17 = arith.cmpf olt, %16, %9 : vector<8x128xf32>
    %18 = arith.cmpf oge, %3, %15 : vector<8x128xf32>
    %19 = arith.extui %18 : vector<8x128xi1> to vector<8x128xi32>
    %20 = arith.sitofp %19 : vector<8x128xi32> to vector<8x128xf32>
    %21 = arith.cmpf ogt, %3, %15 : vector<8x128xf32>
    %22 = arith.extui %21 : vector<8x128xi1> to vector<8x128xi32>
    %23 = arith.sitofp %22 : vector<8x128xi32> to vector<8x128xf32>
    %24 = arith.select %17, %20, %23 : vector<8x128xi1>, vector<8x128xf32>
    %cst_13 = arith.constant dense<0.000000e+00> : vector<8x32xf32>
    %25 = tpu.matmul %24, %8, %cst_13 {dimension_numbers = #tpu.dot_dimension_numbers<[1], [0], [0], [1], [0, 0, 1, 1], [], []>} : vector<8x128xf32>, vector<128x32xf32>, vector<8x32xf32> -> vector<8x32xf32>
    %cst_14 = arith.constant 0.000000e+00 : f32
    %26 = vector.broadcast %cst_14 : f32 to vector<8x32xf32>
    %27 = arith.cmpf oge, %5, %26 : vector<8x32xf32>
    %cst_15 = arith.constant 4.000000e+00 : f32
    %28 = vector.broadcast %cst_15 : f32 to vector<8x32xf32>
    %29 = arith.cmpf olt, %5, %28 : vector<8x32xf32>
    %30 = arith.andi %27, %29 : vector<8x32xi1>
    %cst_16 = arith.constant 0.000000e+00 : f32
    %31 = vector.broadcast %cst_16 : f32 to vector<8x32xf32>
    %32 = arith.cmpf oeq, %25, %31 : vector<8x32xf32>
    %33 = arith.andi %30, %32 : vector<8x32xi1>
    %34 = arith.extui %33 : vector<8x32xi1> to vector<8x32xi32>
    %35 = arith.sitofp %34 : vector<8x32xi32> to vector<8x32xf32>
    %c0_17 = arith.constant 0 : index
    %c0_18 = arith.constant 0 : index
    %36 = vector.load %arg8[%c0_17, %c0_18] : memref<1x32xf32, #tpu.memory_space<vmem>>, vector<1x32xf32>
    %cst_19 = arith.constant dense<0.000000e+00> : vector<32xf32>
    %37 = vector.multi_reduction <add>, %35, %cst_19 [0] : vector<8x32xf32> to vector<32xf32>
    %38 = vector.shape_cast %37 : vector<32xf32> to vector<1x32xf32>
    %39 = arith.addf %36, %38 : vector<1x32xf32>
    %c0_20 = arith.constant 0 : index
    %c0_21 = arith.constant 0 : index
    %40 = vector.load %arg8[%c0_20, %c0_21] : memref<1x32xf32, #tpu.memory_space<vmem>>, vector<1x32xf32>
    tpu.vector_store %arg8[%c0_20, %c0_21], %39 {strides = array<i32>} : memref<1x32xf32, #tpu.memory_space<vmem>>, vector<1x32xf32>,
    %c0_i32_22 = arith.constant 0 : i32
    %41 = arith.cmpi eq, %arg1, %c0_i32_22 : i32
    %42 = arith.extui %41 : i1 to i32
    %c0_i32_23 = arith.constant 0 : i32
    %43 = arith.cmpi ne, %42, %c0_i32_23 : i32
    scf.if %43 {
      %c0_24 = arith.constant 0 : index
      %c0_25 = arith.constant 0 : index
      %44 = vector.load %arg8[%c0_24, %c0_25] : memref<1x32xf32, #tpu.memory_space<vmem>>, vector<1x32xf32>
      %cst_26 = arith.constant dense<0.000000e+00> : vector<1xf32>
      %45 = vector.multi_reduction <add>, %44, %cst_26 [1] : vector<1x32xf32> to vector<1xf32>
      %46 = vector.shape_cast %45 : vector<1xf32> to vector<1x1xf32>
      %47 = vector.shape_cast %46 : vector<1x1xf32> to vector<1x1xf32>
      %48 = vector.broadcast %47 : vector<1x1xf32> to vector<8x128xf32>
      %c0_27 = arith.constant 0 : index
      %c0_28 = arith.constant 0 : index
      %49 = vector.load %arg7[%c0_27, %c0_28] : memref<8x128xf32, #tpu.memory_space<vmem>>, vector<8x128xf32>
      tpu.vector_store %arg7[%c0_27, %c0_28], %48 {strides = array<i32>} : memref<8x128xf32, #tpu.memory_space<vmem>>, vector<8x128xf32>,
    } else {
    }
    return
  }
  func.func @transform_0(%arg0: i32, %arg1: i32) -> (i32, i32) {
    %c1_i32 = arith.constant 1 : i32
    %0 = arith.muli %arg0, %c1_i32 : i32
    %1 = arith.addi %0, %arg1 : i32
    %c0_i32 = arith.constant 0 : i32
    %c0_i32_0 = arith.constant 0 : i32
    return %1, %c0_i32 : i32, i32
  }
  func.func @transform_1(%arg0: i32, %arg1: i32) -> (i32, i32) {
    %c1_i32 = arith.constant 1 : i32
    %0 = arith.muli %arg0, %c1_i32 : i32
    %1 = arith.addi %0, %arg1 : i32
    %c0_i32 = arith.constant 0 : i32
    %c0_i32_0 = arith.constant 0 : i32
    return %1, %c0_i32 : i32, i32
  }
  func.func @transform_2(%arg0: i32, %arg1: i32) -> (i32, i32) {
    %c0_i32 = arith.constant 0 : i32
    %c0_i32_0 = arith.constant 0 : i32
    %c0_i32_1 = arith.constant 0 : i32
    return %c0_i32, %c0_i32_0 : i32, i32
  }
  func.func @transform_3(%arg0: i32, %arg1: i32) -> (i32, i32) {
    %c0_i32 = arith.constant 0 : i32
    %c0_i32_0 = arith.constant 0 : i32
    %c0_i32_1 = arith.constant 0 : i32
    return %c0_i32, %c0_i32_0 : i32, i32
  }
  func.func @transform_4(%arg0: i32, %arg1: i32) -> (i32, i32) {
    %c0_i32 = arith.constant 0 : i32
    %c0_i32_0 = arith.constant 0 : i32
    %c0_i32_1 = arith.constant 0 : i32
    return %c0_i32, %c0_i32_0 : i32, i32
  }
  func.func @transform_5(%arg0: i32, %arg1: i32) -> (i32, i32) {
    %c0_i32 = arith.constant 0 : i32
    %c0_i32_0 = arith.constant 0 : i32
    return %arg0, %c0_i32 : i32, i32
  }
}

</mosaic_0001>

<bundles_post_ra>
// kernel: tpu_custom_call.1
= control target key start
LH: loop header
LB: loop body
LE: loop exit
PB: predicated region body
PF: predicated region fallthrough
CT: control target
= control target key end

     0   :  { %10 = vsyncpa [#allocation4], 0  ;;  %s1286_s0 = inlined_call_operand.vmem [shape: f32[16,128], index: 0, kind: input, shape index: {}]   ;;  %s1287_s1 = inlined_call_operand.vmem [shape: s32[16,32], index: 1, kind: input, shape index: {}]   ;;  %s1288_s2 = inlined_call_operand.vmem [shape: f32[1,128], index: 2, kind: input, shape index: {}]   ;;  %s1289_s3 = inlined_call_operand.vmem [shape: f32[32,128], index: 3, kind: input, shape index: {}]   ;;  %s1290_s4 = inlined_call_operand.vmem [shape: f32[128,32], index: 4, kind: input, shape index: {}]   ;;  %s1291_s5 = inlined_call_operand.hbm [shape: f32[16,128], index: 5, kind: output, shape index: {}]  }
   0x1   :  { %12 = vsyncpa [#allocation4 + $0x1], 0  ;;  %s1042_s18 = smov 0   ;;  %s1044_s19 = smov 0  }
   0x2   :  { %s1046_s20 = smov 0   ;;  %s1048_s21 = smov 0  }
   0x3   :  { %s1050_s22 = smov 0   ;;  %s1052_s23 = smov 0  }
   0x4 LB: > { %s719_s24 = sadd.s32 4294967295, %s1007_s23   ;;  %s720_s25 = sadd.s32 4294967294, %s1007_s23   ;;  %s1007_s23 = sphi %s1052_s23, %s18_s23   ;;  %s1003_s22 = sphi %s1050_s22, %s1298_s22   ;;  %s999_s21 = sphi %s1048_s21, %s1297_s21   ;;  %s995_s20 = sphi %s1046_s20, %s1296_s20   ;;  %s991_s19 = sphi %s1044_s19, %s1295_s19   ;;  %s987_s18 = sphi %s1042_s18, %s1294_s18  }
   0x5   : > { %s30_s26 = sadd.s32 1, %s1003_s22  ;;  %s156_s27 = sadd.s32 1, %s995_s20 }
   0x6   : > { %p32_p0 = scmp.ge.s32.totalorder %s30_s26, 2  ;;  %p166_p1 = scmp.ne.s32.totalorder %s995_s20, %s991_s19 }
   0x7   : > { %p167_p2 = scmp.eq.s32.totalorder %s719_s24, 1  ;;  %p172_p3 = scmp.ne.s32.totalorder %s991_s19, %s987_s18 }
   0x8   : > { %s1300_s26 = smov (%p32_p0, %s30_s26), 0  ;;  %p173_p5 = scmp.eq.s32.totalorder %s720_s25, 1 }
   0x9   : > { %p1082_p4 = por %p167_p2, %p166_p1  ;;  %s153_s29 = ssub.s32 %s1003_s22, %s1300_s26 }
   0xa   : > { %p723_p6 = scmp.ge.s32.totalorder %s1007_s23, 1  ;;  %p154_p7 = scmp.eq.s32.totalorder %s153_s29, 0 }
   0xb   : > { %p1089_p8 = por %p173_p5, %p172_p3  ;;  %p218_p9 = scmp.lt.s32.totalorder %s1007_s23, 3 }
   0xc   : > { %s1095_s6 = scalar_select %p154_p7, %s995_s20, %s156_s27  }
   0xd   : > { %p219_p10 = pnand %p723_p6, %p218_p9 }
   0xe   : > { %p252_p11 = scmp.lt.s32.totalorder (!%p219_p10), %s999_s21, 1  ;;  %s735_s24 = sshll.u32 (!%p219_p10), %s999_s21, 7 }
   0xf   : > { %222 = sbr.rel (%p219_p10) target bundleno = 985 (0x3d9), region = 40  ;;  %s638_s8 = scalar_lea.hbm (!%p219_p10), %s1291_s5, %s735_s24 }
  0x10   : > { %s1011_s12 = smov (!%p219_p10), [#allocation3]  }
  0x11   : > { %s935_s13 = sshll.u32 (!%p219_p10), %s1011_s12, 4  ;;  %s936_s13 = int_to_ptr.vmem [resolvable:$false] %s935_s13 }
  0x14   : > { %v276_v0 = vld [vmem:[%s1289_s3 + $0x18] sm:$0xff]  ;;  %v1009_v1 = vmov 0.0   ;;  %v275_v2 = vld [vmem:[%s1289_s3 + $0x10] sm:$0xff]  ;;  %vm1010_vm0 = vmmov 0   ;;  %s1108_s11 = scalar_select %p252_p11, %s999_s21, 1  ;;  %v274_v3 = vld [vmem:[%s1289_s3 + $0x8] sm:$0xff]  ;;  %v621_v48 = vlaneseq }
  0x15   : > { %782 = vmatprep.subr.mxu1 %v1009_v1  ;;  %790 = vmatprep.mubr.msk.f32.mxu1 %vm1010_vm0, %v1009_v1  ;;  %v273_v4 = vld [vmem:[%s1289_s3] sm:$0xff]  ;;  %vm293_vm1 = vcmask 261120   ;;  %v1133_v7 = vld [vmem:[%s1290_s4 + $0x78] sm:$0xff]  ;;  %v1142_v8 = vld [vmem:[%s1290_s4 + $0x70] sm:$0xff]  ;;  %vm267_vm6 = vcmask 253952   ;;  %s937_s21 = scalar_lea.vmem %s936_s13, 256 }
  0x16   : > { %783 = vmatpush3.msra.mxu1 %v276_v0  ;;  %828 = vmatprep.subr.mxu0 %v1009_v1  ;;  %s725_s14 = sshll.u32 %s1108_s11, 3  ;;  %v290_v9 = vld [vmem:[%s1290_s4 + $0x68] sm:$0xff]  ;;  %v289_v10 = vld [vmem:[%s1290_s4 + $0x60] sm:$0xff]  ;;  %v288_v11 = vld [vmem:[%s1290_s4 + $0x58] sm:$0xff]  ;;  %268 = vst.msk [vmem:[#allocation2] sm:$0x1] %vm267_vm6, %v1009_v1 }
  0x17   : > { %784 = vmatprep.subr.mxu1 %v1009_v1  ;;  %829 = vmatpush3.msra.mxu0 %v276_v0  ;;  %s261_s25 = scalar_lea.vmem %s1287_s1, %s725_s14  ;;  %v287_v12 = vld [vmem:[%s1290_s4 + $0x50] sm:$0xff]  ;;  %v286_v13 = vld [vmem:[%s1290_s4 + $0x48] sm:$0xff]  ;;  %v285_v14 = vld [vmem:[%s1290_s4 + $0x40] sm:$0xff]  ;;  %s255_s15 = scalar_lea.vmem %s1286_s0, %s725_s14  ;;  %v622_v49 = vshrl.u32 %v621_v48, 7 }
  0x18   : > { %785 = vmatpush3.msra.mxu1 %v275_v2  ;;  %830 = vmatprep.subr.mxu0 %v1009_v1  ;;  %v270_v5 = vld [vmem:[%s261_s25] sm:$0xff]  ;;  %v284_v15 = vld [vmem:[%s1290_s4 + $0x38] sm:$0xff]  ;;  %v283_v16 = vld [vmem:[%s1290_s4 + $0x30] sm:$0xff]  ;;  %s248_s11 = sand.u32 1, %s991_s19  }
  0x19   : > { %786 = vmatprep.subr.mxu1 %v1009_v1  ;;  %831 = vmatpush3.msra.mxu0 %v275_v2  ;;  %v1128_v6 = vcvt.s32.f32 %v270_v5  ;;  %v282_v17 = vld [vmem:[%s1290_s4 + $0x28] sm:$0xff]  ;;  %v281_v18 = vld [vmem:[%s1290_s4 + $0x20] sm:$0xff]  ;;  %v280_v19 = vld [vmem:[%s1290_s4 + $0x18] sm:$0xff]  ;;  %s724_s14 = sshll.u32 %s248_s11, 3  ;;  %v623_v50 = vsub.s32 0, %v622_v49  ;;  %s627_s9 = scalar_lea.sflag [#allocation4], %s248_s11 }
  0x1a   : > { %787 = vmatpush3.msra.mxu1 %v274_v3  ;;  %832 = vmatprep.subr.mxu0 %v1009_v1  ;;  %v279_v20 = vld [vmem:[%s1290_s4 + $0x10] sm:$0xff]  ;;  %v278_v21 = vld [vmem:[%s1290_s4 + $0x8] sm:$0xff]  ;;  %v277_v22 = vld [vmem:[%s1290_s4] sm:$0xff]  ;;  %s250_s25 = scalar_lea.vmem [#allocation3], %s724_s14 }
  0x1b   : > { %788 = vmatprep.subr.mxu1 %v1009_v1  ;;  %833 = vmatpush3.msra.mxu0 %v274_v3  ;;  %v728_v23 = vld [vmem:[%s1288_s2] ss:$0 sm:$0xff]  ;;  %vm596_vm7 = vcmp.ge.f32.partialorder %v1128_v6, 0.0  ;;  %vm597_vm8 = vcmp.lt.f32.partialorder %v1128_v6, 4.0  ;;  %s640_s27 = sshll.u32 %s250_s25, 4  ;;  %s641_s27 = int_to_ptr.vmem [resolvable:$true] %s640_s27 }
  0x1c   : > { %789 = vmatpush3.msra.mxu1 %v273_v4  ;;  %834 = vmatprep.subr.mxu0 %v1009_v1  ;;  %v269_v24 = vld [vmem:[%s255_s15] sm:$0xff]  ;;  %vm598_vm9 = vmand %vm596_vm7, %vm597_vm8  ;;  %s931_s10 = scalar_lea.vmem %s641_s27, 128  ;;  %p938_p1 = scmp.lt.s32.totalorder %s641_s27, %s936_s13 }
  0x1d   : > { %791 = vmatmul.mubr.msk.f32.vlgmr.msra.gmra.mxu1 %vm293_vm1, %v1128_v6  ;;  %793 = vmatprep.subr.mxu1 %v1009_v1  ;;  %v603_v43 = vld [vmem:[#allocation2] sm:$0x1]  ;;  %p932_p12 = scmp.ne.s32.totalorder %s641_s27, %s931_s10  ;;  %p939_p2 = scmp.lt.s32.totalorder %s937_s21, %s931_s10 }
  0x1e   : > { %794 = vmatpush3.msra.mxu1 %v1133_v7  ;;  %825 = vmatprep.mubr.msk.f32.mxu1 %vm1010_vm0, %v1009_v1 }
  0x1f   : > { %795 = vmatprep.subr.mxu1 %v1009_v1  ;;  %835 = vmatpush3.msra.mxu0 %v273_v4  ;;  %p933_p13 = pnand %p932_p12, %p1082_p4  ;;  %p940_p3 = por %p939_p2, %p938_p1 }
  0x20   : > { %796 = vmatpush3.msra.mxu1 %v1142_v8  ;;  %836 = vmatprep.mubr.msk.f32.mxu0 %vm1010_vm0, %v1009_v1 }
  0x21   : > { %797 = vmatprep.subr.mxu1 %v1009_v1  ;;  %839 = vmatprep.subr.mxu0 %v1009_v1  ;;  %p934_p0 = pneg %p933_p13 }
  0x22   : > { %798 = vmatpush3.msra.mxu1 %v290_v9 }
  0x23   : > { %799 = vmatprep.subr.mxu1 %v1009_v1  ;;  %p941_p5 = pnand %p940_p3, %p934_p0 }
  0x24   : > { %800 = vmatpush3.msra.mxu1 %v289_v10 }
  0x25   : > { %801 = vmatprep.subr.mxu1 %v1009_v1 }
  0x26   : > { %802 = vmatpush3.msra.mxu1 %v288_v11 }
  0x27   : > { %803 = vmatprep.subr.mxu1 %v1009_v1 }
  0x28   : > { %804 = vmatpush3.msra.mxu1 %v287_v12 }
  0x29   : > { %805 = vmatprep.subr.mxu1 %v1009_v1 }
  0x2a   : > { %806 = vmatpush3.msra.mxu1 %v286_v13 }
  0x2b   : > { %807 = vmatprep.subr.mxu1 %v1009_v1 }
  0x2c   : > { %808 = vmatpush3.msra.mxu1 %v285_v14 }
  0x2d   : > { %809 = vmatprep.subr.mxu1 %v1009_v1 }
  0x2e   : > { %810 = vmatpush3.msra.mxu1 %v284_v15 }
  0x2f   : > { %811 = vmatprep.subr.mxu1 %v1009_v1 }
  0x30   : > { %812 = vmatpush3.msra.mxu1 %v283_v16 }
  0x31   : > { %813 = vmatprep.subr.mxu1 %v1009_v1 }
  0x32   : > { %814 = vmatpush3.msra.mxu1 %v282_v17 }
  0x33   : > { %815 = vmatprep.subr.mxu1 %v1009_v1 }
  0x34   : > { %816 = vmatpush3.msra.mxu1 %v281_v18 }
  0x35   : > { %817 = vmatprep.subr.mxu1 %v1009_v1 }
  0x36   : > { %818 = vmatpush3.msra.mxu1 %v280_v19 }
  0x37   : > { %819 = vmatprep.subr.mxu1 %v1009_v1 }
  0x38   : > { %820 = vmatpush3.msra.mxu1 %v279_v20 }
  0x39   : > { %821 = vmatprep.subr.mxu1 %v1009_v1 }
  0x3a   : > { %822 = vmatpush3.msra.mxu1 %v278_v21 }
  0x3b   : > { %823 = vmatprep.subr.mxu1 %v1009_v1 }
  0x3c   : > { %824 = vmatpush3.msra.mxu1 %v277_v22 }
  0xdd   : > { %v363_v25 = vpop.f32.mrf.mxu1 }
  0xde   : > { %vm373_vm2 = vcmp.eq.f32.partialorder %v728_v23, %v363_v25  ;;  %vm518_vm3 = vcmp.lt.f32.partialorder %v728_v23, %v363_v25 }
  0xdf   : > { %v792_v26 = vpop.f32.mrf.mxu1  ;;  %826 = vmatmul.mubr.msk.f32.vlgmr.msra.gmra.mxu1 %vm373_vm2, %v269_v24 }
 0x19f   : > { %v441_v27 = vpop.f32.mrf.mxu1 }
 0x1a0   : > { %837 = vmatmul.mubr.msk.f32.vlgmr.msra.gmra.mxu0 %vm293_vm1, %v441_v27 }
 0x1a1   : > { %v827_v28 = vpop.f32.mrf.mxu1  ;;  %840 = vmatpush3.msra.mxu0 %v1133_v7  ;;  %871 = vmatprep.mubr.msk.f32.mxu0 %vm1010_vm0, %v1009_v1 }
 0x1a2   : > { %841 = vmatprep.subr.mxu0 %v1009_v1 }
 0x1a3   : > { %842 = vmatpush3.msra.mxu0 %v1142_v8 }
 0x1a4   : > { %843 = vmatprep.subr.mxu0 %v1009_v1 }
 0x1a5   : > { %844 = vmatpush3.msra.mxu0 %v290_v9 }
 0x1a6   : > { %845 = vmatprep.subr.mxu0 %v1009_v1 }
 0x1a7   : > { %846 = vmatpush3.msra.mxu0 %v289_v10 }
 0x1a8   : > { %847 = vmatprep.subr.mxu0 %v1009_v1 }
 0x1a9   : > { %848 = vmatpush3.msra.mxu0 %v288_v11 }
 0x1aa   : > { %849 = vmatprep.subr.mxu0 %v1009_v1 }
 0x1ab   : > { %850 = vmatpush3.msra.mxu0 %v287_v12 }
 0x1ac   : > { %851 = vmatprep.subr.mxu0 %v1009_v1 }
 0x1ad   : > { %852 = vmatpush3.msra.mxu0 %v286_v13 }
 0x1ae   : > { %853 = vmatprep.subr.mxu0 %v1009_v1 }
 0x1af   : > { %854 = vmatpush3.msra.mxu0 %v285_v14 }
 0x1b0   : > { %855 = vmatprep.subr.mxu0 %v1009_v1 }
 0x1b1   : > { %856 = vmatpush3.msra.mxu0 %v284_v15 }
 0x1b2   : > { %857 = vmatprep.subr.mxu0 %v1009_v1 }
 0x1b3   : > { %858 = vmatpush3.msra.mxu0 %v283_v16 }
 0x1b4   : > { %859 = vmatprep.subr.mxu0 %v1009_v1 }
 0x1b5   : > { %860 = vmatpush3.msra.mxu0 %v282_v17 }
 0x1b6   : > { %861 = vmatprep.subr.mxu0 %v1009_v1 }
 0x1b7   : > { %862 = vmatpush3.msra.mxu0 %v281_v18 }
 0x1b8   : > { %863 = vmatprep.subr.mxu0 %v1009_v1 }
 0x1b9   : > { %864 = vmatpush3.msra.mxu0 %v280_v19 }
 0x1ba   : > { %865 = vmatprep.subr.mxu0 %v1009_v1 }
 0x1bb   : > { %866 = vmatpush3.msra.mxu0 %v279_v20 }
 0x1bc   : > { %867 = vmatprep.subr.mxu0 %v1009_v1 }
 0x1bd   : > { %868 = vmatpush3.msra.mxu0 %v278_v21 }
 0x1be   : > { %869 = vmatprep.subr.mxu0 %v1009_v1 }
 0x1bf   : > { %870 = vmatpush3.msra.mxu0 %v277_v22 }
 0x260   : > { %v514_v29 = vpop.f32.mrf.mxu0 }
 0x261   : > { %vm519_vm4 = vcmp.ge.f32.partialorder %v269_v24, %v514_v29  ;;  %vm522_vm5 = vcmp.gt.f32.partialorder %v269_v24, %v514_v29 }
 0x262   : > { %v731_v30 = vsel %vm519_vm4, 1.0, %v1009_v1  ;;  %v732_v31 = vsel %vm522_vm5, 1.0, %v1009_v1  ;;  %v838_v32 = vpop.f32.mrf.mxu0 }
 0x263   : > { %v525_v33 = vsel %vm518_vm3, %v731_v30, %v732_v31 }
 0x264   : > { %872 = vmatmul.mubr.f32.vlgmr.msra.gmra.mxu0 %v525_v33 }
 0x324   : > { %v592_v34 = vpop.f32.mrf.mxu0 }
 0x325   : > { %vm599_vm10 = vcmp.eq.f32.partialorder %v592_v34, 0.0 }
 0x326   : > { %vm600_vm11 = vmand %vm598_vm9, %vm599_vm10  ;;  %v873_v35 = vpop.f32.mrf.mxu0 }
 0x327   : > { %v733_v36 = vsel %vm600_vm11, 1.0, %v1009_v1 }
 0x328   : > { %v604_v37 = vsel %vm293_vm1, %v733_v36, 0.0 }
 0x329   : > { %v605_v38 = vrot.slane %v604_v37, 4 }
 0x32b   : > { %v606_v39 = vadd.f32 %v605_v38, %v604_v37 }
 0x32d   : > { %v607_v40 = vrot.slane %v606_v39, 2 }
 0x32f   : > { %v608_v41 = vadd.f32 %v607_v40, %v606_v39 }
 0x331   : > { %v609_v42 = vrot.slane %v608_v41, 1 }
 0x333   : > { %v610_v44 = vadd.f32 %v609_v42, %v608_v41 }
 0x335   : > { %v611_v45 = vadd.f32 %v610_v44, %v603_v43 }
 0x337   : > { %613 = vst.msk [vmem:[#allocation2] sm:$0x1] %vm267_vm6, %v611_v45 }
 0x33e   : > { %v617_v46 = vld [vmem:[#allocation2] sm:$0x1] }
 0x33f   : > { %v618_v47 = vsel %vm267_vm6, %v617_v46, 0.0 }
 0x340   : > { %619 = vadd.xlane.f32.xlu0 %v618_v47 }
 0x3c9   : > { %v620_v51 = vpop.xlane.xlu0 %619 }
 0x3ca   : > { %v624_v52 = vrot.slane %v620_v51, %v623_v50 }
 0x3cc   : > { %625 = vst [vmem:[%s250_s25] sm:$0xff] %v624_v52 }
 0x3cd   : > { %944 = shalt.err (!%p941_p5)
}
 0x3ce   : > { %s945_s15 = scalar_lea.hbm %s638_s8, 128  ;;  %s949_s11 = scalar_lea.hbm %s1291_s5, 256 }
 0x3cf   : > { %p946_p6 = scmp.ne.s32.totalorder %s638_s8, %s945_s15  ;;  %p950_p10 = scmp.lt.s32.totalorder %s638_s8, %s1291_s5 }
 0x3d0   : > { %p951_p11 = scmp.lt.s32.totalorder %s949_s11, %s945_s15 }
 0x3d1   : > { %p947_p7 = pnand %p946_p6, %p1082_p4 }
 0x3d2   : > { %p952_p12 = por %p951_p11, %p950_p10 }
 0x3d3   : > { %p948_p9 = pneg %p947_p7 }
 0x3d5   : > { %p953_p13 = pnand %p952_p12, %p948_p9 }
 0x3d7   : > { %956 = shalt.err (!%p953_p13)
}
 0x3d8   : > { %874 = dma.vmem_to_hbm [thread:$0]  (%p1082_p4), %s641_s27, 128, %s638_s8, %s627_s9  }
 0x3d9 PF: > { %p880_p0 = scmp.ge.s32.totalorder %s1007_s23, 2  ;;  %s652_s25 = sand.u32 1, %s987_s18  }
 0x3da   : > { %s653_s29 = scalar_lea.sflag [#allocation4], %s652_s25 }
 0x3db   : > { %p877_p1 = pnand %p880_p0, %p1089_p8 }
 0x3dd   : > { %p878_p2 = pneg %p877_p1 }
 0x3df   : > { %982 = dma.done.wait (%p878_p2), %s653_s29, 128  }
 0x3e0   : > { %984 = vsyncadd (%p878_p2), %s653_s29, 4294967168  ;;  %s18_s23 = sadd.s32 1, %s1007_s23   ;;  %s1294_s18 = smov %s991_s19 }
 0x3e1   : > { %p15_p3 = scmp.ge.s32.totalorder %s18_s23, 4   ;;  %s1295_s19 = smov %s995_s20 }
 0x3e2   : > { %s1296_s20 = smov %s1095_s6  ;;  %s1297_s21 = smov %s1003_s22 }
 0x3e3   : > { %s1298_s22 = smov %s1300_s26  ;;  %17 = sbr.rel (!%p15_p3) target bundleno = 4 (0x4), region = 86 }
 0x3e8   :  { %658 = vsyncpa [#allocation4], 1 }
 0x3e9   :  { %660 = vsyncpa [#allocation4 + $0x1], 1 }

</bundles_post_ra>
